<compile_context>
chip_gen: v7x
topology: tpu7x:2x2x1
jax: 0.10.0
libtpu: 0.0.40
codegen_flags: <defaults>
</compile_context>

<pallas_src>
import functools

import jax
import jax.numpy as jnp
from jax import lax
from jax.experimental import pallas as pl
from jax.experimental.pallas import tpu as pltpu


def _round_up(n, m):
    return (n + m - 1) // m * m


def _round_down(n, m):
    return n // m * m


def _mlp_kernel(x_ref, w1_ref, b1_ref, w2_ref, b2_ref, w3_ref, b3_ref, o_ref):
    """Fused 3-layer MLP on one batch tile.

    x_ref : (TILE_B, D)    input tile, exactly as laid out in HBM
    w*_ref: (out_f, in_f)  PyTorch-native weight layout
    b*_ref: (out_f, 1)     bias columns (broadcast over batch lanes)
    o_ref : (1, TILE_B)    lane-dense output row (batch on lanes)
    """
    # layer1: contract over D -> (16, TILE_B); batch lands on the lane axis
    # without any wrapper-side HBM transpose of x.
    h1 = lax.dot_general(
        w1_ref[...], x_ref[...],
        dimension_numbers=(((1,), (1,)), ((), ())),
        preferred_element_type=jnp.float32)
    h1 = jnp.maximum(h1 + b1_ref[...], 0.0)

    # layer2: (8, 16) @ (16, TILE_B) -> (8, TILE_B)
    h2 = jnp.dot(w2_ref[...], h1, preferred_element_type=jnp.float32)
    h2 = jnp.maximum(h2 + b2_ref[...], 0.0)

    # output_layer: (1, 8) @ (8, TILE_B) -> (1, TILE_B)
    out = jnp.dot(w3_ref[...], h2, preferred_element_type=jnp.float32)
    out = out + b3_ref[...]

    o_ref[...] = out.astype(o_ref.dtype)


@functools.partial(jax.jit, static_argnames=("tile_b",))
def simple_neural_network_forward(x, w1, b1, w2, b2, w3, b3, *, tile_b=None):
    """Forward pass of SimpleNeuralNetwork.

    x : (B, input_dim) float32
    w1: (16, input_dim), b1: (16,)   -- PyTorch nn.Linear layout
    w2: (8, 16),         b2: (8,)
    w3: (1, 8),          b3: (1,)
    Returns (B, 1) float32.
    """
    B, D = x.shape
    bp = _round_up(B, 128)          # batch rounded to whole lanes

    if tile_b is None:
        # Byte-budgeted x block (~2 MiB): big enough to amortize the
        # ~0.35 us/step grid overhead, small enough (x2 double-buffered)
        # for v7x's 64 MiB VMEM even at large D.
        block_budget_bytes = 2 * 1024 * 1024
        tile_b = max(128, _round_down(block_budget_bytes // (4 * D), 128))
    tile_b = max(128, _round_up(tile_b, 128))
    tile_b = min(tile_b, bp)
    if B >= 256:
        # Guarantee >=2 grid steps so "parallel" shards across both v7x TCs.
        tile_b = min(tile_b, _round_up(pl.cdiv(bp, 2), 128))

    grid = (pl.cdiv(B, tile_b),)

    b1c = b1.reshape(-1, 1)
    b2c = b2.reshape(-1, 1)
    b3c = b3.reshape(-1, 1)

    # Weights/biases: same block every grid step -> stay resident in VMEM.
    resident = lambda arr: pl.BlockSpec(arr.shape, lambda i: (0, 0))

    # Scoped VMEM sized to the chosen blocks (2x double-buffered x block +
    # double-buffered output row + params + headroom); keeps the kernel
    # within v5e's 16 MiB / v6e & v7x 32 MiB scoped defaults regardless.
    x_block_bytes = tile_b * D * 4
    out_block_bytes = tile_b * 4
    param_bytes = 4 * (16 * D + 16 + 16 * 8 + 8 + 8 + 1)
    vmem_limit = min(32 << 20,
                     max(4 << 20,
                         2 * x_block_bytes + 2 * out_block_bytes
                         + param_bytes + (1 << 20)))

    flops = 2 * B * (D * 16 + 16 * 8 + 8 * 1)
    bytes_accessed = 4 * (B * D + B) + param_bytes

    out_row = pl.pallas_call(
        _mlp_kernel,
        out_shape=jax.ShapeDtypeStruct((1, B), jnp.float32),
        grid=grid,
        in_specs=[
            pl.BlockSpec((tile_b, D), lambda i: (i, 0)),    # pipelined x tile
            resident(w1), resident(b1c),
            resident(w2), resident(b2c),
            resident(w3), resident(b3c),
        ],
        out_specs=pl.BlockSpec((1, tile_b), lambda i: (0, i)),  # lane-dense
        compiler_params=pltpu.CompilerParams(
            dimension_semantics=("parallel",),
            vmem_limit_bytes=vmem_limit),
        cost_estimate=pl.CostEstimate(
            flops=flops, transcendentals=0, bytes_accessed=bytes_accessed),
    )(x, w1, b1c, w2, b2c, w3, b3c)

    # Back to the PyTorch-facing (B, 1) shape (trivial transpose of (1, B)).
    return out_row.T


def init_params(key, input_dim):
    """nn.Linear-style U(-1/sqrt(fan_in), 1/sqrt(fan_in)) init.

    Weights kept in PyTorch-native (out_features, in_features) layout,
    which is exactly what the kernel consumes.
    """
    dims = [(16, input_dim), (8, 16), (1, 8)]
    params = []
    for (out_f, in_f) in dims:
        key, kw, kb = jax.random.split(key, 3)
        bound = 1.0 / jnp.sqrt(in_f)
        w = jax.random.uniform(kw, (out_f, in_f), jnp.float32, -bound, bound)
        b = jax.random.uniform(kb, (out_f,), jnp.float32, -bound, bound)
        params.append((w, b))
    return params


# TODO(synk): the PyTorch module's .train() (Adam + MSE loop) is host-side
# training logic, not part of the forward pass, and is not implemented here.

if __name__ == "__main__":
    key = jax.random.PRNGKey(0)
    key, kx = jax.random.split(key)

    batch = 200          # exercises a 2-step grid with a masked partial block
    input_dim = 32
    tile_b = 128         # small explicit tile so the demo runs >1 grid step

    x = jax.random.normal(kx, (batch, input_dim), dtype=jnp.float32)
    (w1, b1), (w2, b2), (w3, b3) = init_params(key, input_dim)

    out = simple_neural_network_forward(x, w1, b1, w2, b2, w3, b3,
                                        tile_b=tile_b)
    out = jax.block_until_ready(out)

    # Also exercise the default byte-budgeted tiling path.
    out_default = jax.block_until_ready(
        simple_neural_network_forward(x, w1, b1, w2, b2, w3, b3))

    # Pure-JAX reference of the same forward pass (PyTorch weight layout).
    h = jnp.maximum(x @ w1.T + b1, 0.0)
    h = jnp.maximum(h @ w2.T + b2, 0.0)
    ref = h @ w3.T + b3

    assert out.shape == (batch, 1)
    assert jnp.allclose(out, ref, atol=1e-5, rtol=1e-5)
    assert jnp.allclose(out_default, ref, atol=1e-5, rtol=1e-5)

    print("KERNEL_OK")
</pallas_src>

<mosaic_0001>
module attributes {stable_mosaic.version = 11 : i64} {
  func.func @_mlp_kernel(%arg0: i32, %arg1: memref<128x32xf32, #tpu.memory_space<vmem>>, %arg2: memref<16x32xf32, #tpu.memory_space<vmem>>, %arg3: memref<16x1xf32, #tpu.memory_space<vmem>>, %arg4: memref<8x16xf32, #tpu.memory_space<vmem>>, %arg5: memref<8x1xf32, #tpu.memory_space<vmem>>, %arg6: memref<1x8xf32, #tpu.memory_space<vmem>>, %arg7: memref<1x1xf32, #tpu.memory_space<vmem>>, %arg8: memref<1x128xf32, #tpu.memory_space<vmem>>) attributes {dimension_semantics = [#tpu.dimension_semantics<parallel>], iteration_bounds = array<i64: 2>, scalar_prefetch = 0 : i64, scratch_operands = 0 : i64, tpu.core_type = #tpu.core_type<tc>, window_params = [{transform_indices = @transform_0, window_bounds = array<i64: 128, 32>}, {pipeline_mode = #tpu.pipeline_mode<synchronous>, transform_indices = @transform_1, window_bounds = array<i64: 16, 32>}, {pipeline_mode = #tpu.pipeline_mode<synchronous>, transform_indices = @transform_2, window_bounds = array<i64: 16, 1>}, {pipeline_mode = #tpu.pipeline_mode<synchronous>, transform_indices = @transform_3, window_bounds = array<i64: 8, 16>}, {pipeline_mode = #tpu.pipeline_mode<synchronous>, transform_indices = @transform_4, window_bounds = array<i64: 8, 1>}, {pipeline_mode = #tpu.pipeline_mode<synchronous>, transform_indices = @transform_5, window_bounds = array<i64: 1, 8>}, {pipeline_mode = #tpu.pipeline_mode<synchronous>, transform_indices = @transform_6, window_bounds = array<i64: 1, 1>}, {transform_indices = @transform_7, window_bounds = array<i64: 1, 128>}]} {
    %c0 = arith.constant 0 : index
    %c0_0 = arith.constant 0 : index
    %0 = vector.load %arg2[%c0, %c0_0] : memref<16x32xf32, #tpu.memory_space<vmem>>, vector<16x32xf32>
    %c0_1 = arith.constant 0 : index
    %c0_2 = arith.constant 0 : index
    %1 = vector.load %arg1[%c0_1, %c0_2] : memref<128x32xf32, #tpu.memory_space<vmem>>, vector<128x32xf32>
    %cst = arith.constant dense<0.000000e+00> : vector<16x128xf32>
    %2 = tpu.matmul %0, %1, %cst {dimension_numbers = #tpu.dot_dimension_numbers<[1], [1], [0], [0], [0, 0, 1, 0], [], []>} : vector<16x32xf32>, vector<128x32xf32>, vector<16x128xf32> -> vector<16x128xf32>
    %c0_3 = arith.constant 0 : index
    %c0_4 = arith.constant 0 : index
    %3 = vector.load %arg3[%c0_3, %c0_4] : memref<16x1xf32, #tpu.memory_space<vmem>>, vector<16x1xf32>
    %4 = vector.broadcast %3 : vector<16x1xf32> to vector<16x128xf32>
    %5 = arith.addf %2, %4 : vector<16x128xf32>
    %cst_5 = arith.constant 0.000000e+00 : f32
    %6 = vector.broadcast %cst_5 : f32 to vector<16x128xf32>
    %7 = arith.maximumf %5, %6 : vector<16x128xf32>
    %c0_6 = arith.constant 0 : index
    %c0_7 = arith.constant 0 : index
    %8 = vector.load %arg4[%c0_6, %c0_7] : memref<8x16xf32, #tpu.memory_space<vmem>>, vector<8x16xf32>
    %cst_8 = arith.constant dense<0.000000e+00> : vector<8x128xf32>
    %9 = tpu.matmul %8, %7, %cst_8 {dimension_numbers = #tpu.dot_dimension_numbers<[1], [0], [0], [1], [0, 0, 1, 1], [], []>} : vector<8x16xf32>, vector<16x128xf32>, vector<8x128xf32> -> vector<8x128xf32>
    %c0_9 = arith.constant 0 : index
    %c0_10 = arith.constant 0 : index
    %10 = vector.load %arg5[%c0_9, %c0_10] : memref<8x1xf32, #tpu.memory_space<vmem>>, vector<8x1xf32>
    %11 = vector.broadcast %10 : vector<8x1xf32> to vector<8x128xf32>
    %12 = arith.addf %9, %11 : vector<8x128xf32>
    %cst_11 = arith.constant 0.000000e+00 : f32
    %13 = vector.broadcast %cst_11 : f32 to vector<8x128xf32>
    %14 = arith.maximumf %12, %13 : vector<8x128xf32>
    %c0_12 = arith.constant 0 : index
    %c0_13 = arith.constant 0 : index
    %15 = vector.load %arg6[%c0_12, %c0_13] : memref<1x8xf32, #tpu.memory_space<vmem>>, vector<1x8xf32>
    %cst_14 = arith.constant dense<0.000000e+00> : vector<1x128xf32>
    %16 = tpu.matmul %15, %14, %cst_14 {dimension_numbers = #tpu.dot_dimension_numbers<[1], [0], [0], [1], [0, 0, 1, 1], [], []>} : vector<1x8xf32>, vector<8x128xf32>, vector<1x128xf32> -> vector<1x128xf32>
    %c0_15 = arith.constant 0 : index
    %c0_16 = arith.constant 0 : index
    %17 = vector.load %arg7[%c0_15, %c0_16] : memref<1x1xf32, #tpu.memory_space<vmem>>, vector<1x1xf32>
    %18 = vector.broadcast %17 : vector<1x1xf32> to vector<1x128xf32>
    %19 = arith.addf %16, %18 : vector<1x128xf32>
    %c0_17 = arith.constant 0 : index
    %c0_18 = arith.constant 0 : index
    %20 = vector.load %arg8[%c0_17, %c0_18] : memref<1x128xf32, #tpu.memory_space<vmem>>, vector<1x128xf32>
    tpu.vector_store %arg8[%c0_17, %c0_18], %19 {strides = array<i32>} : memref<1x128xf32, #tpu.memory_space<vmem>>, vector<1x128xf32>,
    return
  }
  func.func @transform_0(%arg0: i32) -> (i32, i32) {
    %c0_i32 = arith.constant 0 : i32
    %c0_i32_0 = arith.constant 0 : i32
    return %arg0, %c0_i32 : i32, i32
  }
  func.func @transform_1(%arg0: i32) -> (i32, i32) {
    %c0_i32 = arith.constant 0 : i32
    %c0_i32_0 = arith.constant 0 : i32
    %c0_i32_1 = arith.constant 0 : i32
    return %c0_i32, %c0_i32_0 : i32, i32
  }
  func.func @transform_2(%arg0: i32) -> (i32, i32) {
    %c0_i32 = arith.constant 0 : i32
    %c0_i32_0 = arith.constant 0 : i32
    %c0_i32_1 = arith.constant 0 : i32
    return %c0_i32, %c0_i32_0 : i32, i32
  }
  func.func @transform_3(%arg0: i32) -> (i32, i32) {
    %c0_i32 = arith.constant 0 : i32
    %c0_i32_0 = arith.constant 0 : i32
    %c0_i32_1 = arith.constant 0 : i32
    return %c0_i32, %c0_i32_0 : i32, i32
  }
  func.func @transform_4(%arg0: i32) -> (i32, i32) {
    %c0_i32 = arith.constant 0 : i32
    %c0_i32_0 = arith.constant 0 : i32
    %c0_i32_1 = arith.constant 0 : i32
    return %c0_i32, %c0_i32_0 : i32, i32
  }
  func.func @transform_5(%arg0: i32) -> (i32, i32) {
    %c0_i32 = arith.constant 0 : i32
    %c0_i32_0 = arith.constant 0 : i32
    %c0_i32_1 = arith.constant 0 : i32
    return %c0_i32, %c0_i32_0 : i32, i32
  }
  func.func @transform_6(%arg0: i32) -> (i32, i32) {
    %c0_i32 = arith.constant 0 : i32
    %c0_i32_0 = arith.constant 0 : i32
    %c0_i32_1 = arith.constant 0 : i32
    return %c0_i32, %c0_i32_0 : i32, i32
  }
  func.func @transform_7(%arg0: i32) -> (i32, i32) {
    %c0_i32 = arith.constant 0 : i32
    %c0_i32_0 = arith.constant 0 : i32
    return %c0_i32, %arg0 : i32, i32
  }
}

</mosaic_0001>

<bundles_post_ra>
// kernel: simple_neural_network_forward.1
= control target key start
LH: loop header
LB: loop body
LE: loop exit
PB: predicated region body
PF: predicated region fallthrough
CT: control target
= control target key end

     0   :  { %s1185_s0 = inlined_call_operand.vmem [shape: f32[200,32], index: 0, kind: input, shape index: {}]   ;;  %s1186_s1 = inlined_call_operand.vmem [shape: f32[16,32], index: 1, kind: input, shape index: {}]   ;;  %s1187_s2 = inlined_call_operand.vmem [shape: f32[16,1], index: 2, kind: input, shape index: {}]   ;;  %s1188_s3 = inlined_call_operand.vmem [shape: f32[8,16], index: 3, kind: input, shape index: {}]   ;;  %s1189_s4 = inlined_call_operand.vmem [shape: f32[8,1], index: 4, kind: input, shape index: {}]   ;;  %s1190_s5 = inlined_call_operand.vmem [shape: f32[1,8], index: 5, kind: input, shape index: {}]   ;;  %s1191_s6 = inlined_call_operand.<no memory space> [shape: f32[1,1], index: 6, kind: input, shape index: {}]   ;;  %s1192_s7 = inlined_call_operand.hbm [shape: f32[1,200], index: 7, kind: output, shape index: {}]  }
   0x1   :  { %v12_v0 = vstv %s1191_s6 }
   0x2   :  { %13 = vst [vmem:[#allocation2] sm:$0x1] %v12_v0 }
   0x3   :  { %14 = vsyncpa [#allocation4], 0 }
   0x4   :  { %16 = vsyncpa [#allocation4 + $0x1], 0  ;;  %s1005_s26 = smov 0   ;;  %s1007_s27 = smov 0  }
   0x5   :  { %s1009_s28 = smov 0   ;;  %s1011_s29 = smov 0  }
   0x6 LB: > { %s697_s6 = sadd.s32 4294967295, %s955_s29   ;;  %s698_s30 = sadd.s32 4294967294, %s955_s29   ;;  %s955_s29 = sphi %s1011_s29, %s1200_s29   ;;  %s951_s28 = sphi %s1009_s28, %s1199_s28   ;;  %s947_s27 = sphi %s1007_s27, %s1198_s27   ;;  %s943_s26 = sphi %s1005_s26, %s1197_s26  }
   0x7   : > { %s1028_s8 = sadd.s32 1, %s955_s29   ;;  %s181_s9 = sadd.s32 1, %s951_s28 }
   0x8   : > { %s178_s10 = ssub.s32 %s955_s29, %s1028_s8  ;;  %p191_p0 = scmp.ne.s32.totalorder %s951_s28, %s947_s27 }
   0x9   : > { %p179_p1 = scmp.eq.s32.totalorder %s178_s10, 0  ;;  %p192_p2 = scmp.eq.s32.totalorder %s697_s6, 1 }
   0xa   : > { %p197_p3 = scmp.ne.s32.totalorder %s947_s27, %s943_s26  ;;  %p198_p4 = scmp.eq.s32.totalorder %s698_s30, 1 }
   0xb   : > { %s1038_s11 = scalar_select %p179_p1, %s951_s28, %s181_s9  }
   0xc   : > { %p1040_p5 = por %p192_p2, %p191_p0  ;;  %p1044_p6 = por %p198_p4, %p197_p3 }
   0xd   : > { %p701_p7 = scmp.ge.s32.totalorder %s955_s29, 1  ;;  %p251_p8 = scmp.lt.s32.totalorder %s955_s29, 3 }
   0xf   : > { %p252_p9 = pnand %p701_p7, %p251_p8 }
  0x10   : > { %s1050_s14 = sshll.u32 (!%p252_p9), %s697_s6, 4  ;;  %vm330_vm0 = vcmask (!%p252_p9), 261120   ;;  %v300_v1 = vld [vmem:[%s1186_s1] sm:$0xff] (!%p252_p9)  ;;  %v957_v3 = vmov (!%p252_p9), 0   ;;  %v319_v4 = vld [vmem:[%s1187_s2 + $0x8] sm:$0xff] (!%p252_p9)  ;;  %v958_v31 = vmov (!%p252_p9), 0.0|0.0   ;;  %v551_v51 = vlaneseq (!%p252_p9) }
  0x11   : > { %255 = sbr.rel (%p252_p9) target bundleno = 762 (0x2fa), region = 48  ;;  %v318_v2 = vld [vmem:[%s1187_s2] sm:$0xff] (!%p252_p9)  ;;  %p291_p10 = scmp.lt.s32.totalorder (!%p252_p9), %s1050_s14, 24  ;;  %782 = vmatprep.mubr.msk.f32.mxu0 (!%p252_p9), %vm330_vm0, %v300_v1  ;;  %891 = vset.pattern.permute.xlu0 (!%p252_p9), %v957_v3  ;;  %vm1071_vm1 = vmpackc.low (!%p252_p9), %vm330_vm0, %vm330_vm0  ;;  %v301_v30 = vld [vmem:[%s1186_s1 + $0x8] sm:$0xff] (!%p252_p9)  ;;  %vm959_vm2 = vmmov (!%p252_p9), 0   ;;  %v960_v32 = vmov (!%p252_p9), 0.0  }
  0x12   : > { %322 = vperm.xlu0 (!%p252_p9), %891, %v318_v2   ;;  %892 = vset.pattern.permute.xlu1 (!%p252_p9), %v957_v3  ;;  %v463_v33 = vld [vmem:[%s1189_s4] sm:$0xff] (!%p252_p9)  ;;  %vm469_vm3 = vcmask (!%p252_p9), 130048   ;;  %vm555_vm4 = vcmask (!%p252_p9), 64512   ;;  %v552_v52 = vshrl.u32 (!%p252_p9), %v551_v51, 7  ;;  %s1143_s24 = scalar_lea.hbm (!%p252_p9), %s1192_s7, %s1050_s14  ;;  %s961_s30 = smov (!%p252_p9), [#allocation3]  }
  0x13   : > { %845 = vmatprep.subr.bf16.mxu1 (!%p252_p9), %v958_v31  ;;  %789 = vmatprep.mubr.msk.f32.mxu1 (!%p252_p9), %vm959_vm2, %v960_v32  ;;  %v545_v34 = vld [vmem:[#allocation2] sm:$0x1] (!%p252_p9)  ;;  %s897_s9 = sshll.u32 (!%p252_p9), %s961_s30, 4  ;;  %s898_s9 = int_to_ptr.vmem [resolvable:$false] %s897_s9 }
  0x14   : > { %466 = vperm.xlu1 (!%p252_p9), %892, %v463_v33   ;;  %v462_v44 = vld [vmem:[%s1188_s3] sm:$0xff] (!%p252_p9)  ;;  %v553_v53 = vsub.s32 (!%p252_p9), 0, %v552_v52  ;;  %s899_s10 = scalar_lea.vmem (!%p252_p9), %s898_s9, 32 }
  0x15   : > { %v544_v50 = vld [vmem:[%s1190_s5] sm:$0x1] (!%p252_p9) }
  0x16   : > { %327 = vperm.xlu0 (!%p252_p9), %891, %v319_v4  }
  0x18   : > { %s292_s19 = scalar_select %p291_p10, %s1050_s14, 24  ;;  %548 = vperm.xlu1 %892, %v545_v34  }
  0x1a   : > { %s703_s22 = sshll.u32 %s292_s19, 3  ;;  %s284_s19 = sand.u32 1, %s947_s27  }
  0x1b   : > { %s1067_s25 = scalar_lea.vmem %s1185_s0, %s703_s22  ;;  %s285_s20 = scalar_lea.vmem [#allocation3], %s284_s19 }
  0x1c   : > { %v302_v6 = vld [vmem:[%s1067_s25] sm:$0xff]  ;;  %v303_v7 = vld [vmem:[%s1067_s25 + $0x8] sm:$0xff]  ;;  %v304_v8 = vld [vmem:[%s1067_s25 + $0x10] sm:$0xff]  ;;  %s643_s21 = sshll.u32 %s285_s20, 4  ;;  %s1145_s21 = int_to_ptr.vmem [resolvable:$true] %s643_s21 }
  0x1d   : > { %v797_v9 = vpack.c.bf16 %v303_v7, %v302_v6  ;;  %v305_v10 = vld [vmem:[%s1067_s25 + $0x18] sm:$0xff]  ;;  %v306_v12 = vld [vmem:[%s1067_s25 + $0x20] sm:$0xff]  ;;  %v307_v13 = vld [vmem:[%s1067_s25 + $0x28] sm:$0xff]  ;;  %s893_s6 = scalar_lea.vmem %s1145_s21, 16  ;;  %p900_p0 = scmp.lt.s32.totalorder %s1145_s21, %s898_s9 }
  0x1e   : > { %v803_v11 = vpack.c.bf16 %v305_v10, %v304_v8  ;;  %v809_v14 = vpack.c.bf16 %v307_v13, %v306_v12  ;;  %v308_v15 = vld [vmem:[%s1067_s25 + $0x30] sm:$0xff]  ;;  %v309_v16 = vld [vmem:[%s1067_s25 + $0x38] sm:$0xff]  ;;  %v310_v18 = vld [vmem:[%s1067_s25 + $0x40] sm:$0xff]  ;;  %p894_p11 = scmp.ne.s32.totalorder %s1145_s21, %s893_s6  ;;  %p901_p1 = scmp.lt.s32.totalorder %s899_s10, %s893_s6 }
  0x1f   : > { %799 = vmatprep.subr.msk.bf16.mxu0 %vm1071_vm1, %v797_v9  ;;  %v815_v17 = vpack.c.bf16 %v309_v16, %v308_v15  ;;  %v311_v19 = vld [vmem:[%s1067_s25 + $0x48] sm:$0xff]  ;;  %v312_v21 = vld [vmem:[%s1067_s25 + $0x50] sm:$0xff]  ;;  %v313_v22 = vld [vmem:[%s1067_s25 + $0x58] sm:$0xff] }
  0x20   : > { %802 = vmatpush3.bf16.xpose.msk.msra.mxu0 %vm1071_vm1, %v797_v9  ;;  %v821_v20 = vpack.c.bf16 %v311_v19, %v310_v18  ;;  %v827_v23 = vpack.c.bf16 %v313_v22, %v312_v21  ;;  %v314_v24 = vld [vmem:[%s1067_s25 + $0x60] sm:$0xff]  ;;  %v315_v25 = vld [vmem:[%s1067_s25 + $0x68] sm:$0xff]  ;;  %v316_v27 = vld [vmem:[%s1067_s25 + $0x70] sm:$0xff]  ;;  %p895_p12 = pnand %p894_p11, %p1040_p5  ;;  %p902_p2 = por %p901_p1, %p900_p0 }
  0x21   : > { %805 = vmatprep.subr.msk.bf16.mxu0 %vm1071_vm1, %v803_v11  ;;  %v833_v26 = vpack.c.bf16 %v315_v25, %v314_v24  ;;  %v317_v28 = vld [vmem:[%s1067_s25 + $0x78] sm:$0xff]  ;;  %s631_s25 = scalar_lea.sflag [#allocation4], %s284_s19 }
  0x22   : > { %v839_v29 = vpack.c.bf16 %v317_v28, %v316_v27  ;;  %p896_p13 = pneg %p895_p12 }
  0x24   : > { %p903_p3 = pnand %p902_p2, %p896_p13 }
  0x28   : > { %808 = vmatpush3.bf16.xpose.msk.msra.mxu0 %vm1071_vm1, %v803_v11 }
  0x29   : > { %811 = vmatprep.subr.msk.bf16.mxu0 %vm1071_vm1, %v809_v14 }
  0x30   : > { %814 = vmatpush3.bf16.xpose.msk.msra.mxu0 %vm1071_vm1, %v809_v14 }
  0x31   : > { %817 = vmatprep.subr.msk.bf16.mxu0 %vm1071_vm1, %v815_v17 }
  0x38   : > { %820 = vmatpush3.bf16.xpose.msk.msra.mxu0 %vm1071_vm1, %v815_v17 }
  0x39   : > { %823 = vmatprep.subr.msk.bf16.mxu0 %vm1071_vm1, %v821_v20 }
  0x40   : > { %826 = vmatpush3.bf16.xpose.msk.msra.mxu0 %vm1071_vm1, %v821_v20 }
  0x41   : > { %829 = vmatprep.subr.msk.bf16.mxu0 %vm1071_vm1, %v827_v23 }
  0x48   : > { %832 = vmatpush3.bf16.xpose.msk.msra.mxu0 %vm1071_vm1, %v827_v23 }
  0x49   : > { %835 = vmatprep.subr.msk.bf16.mxu0 %vm1071_vm1, %v833_v26 }
  0x50   : > { %838 = vmatpush3.bf16.xpose.msk.msra.mxu0 %vm1071_vm1, %v833_v26 }
  0x51   : > { %841 = vmatprep.subr.msk.bf16.mxu0 %vm1071_vm1, %v839_v29 }
  0x58   : > { %844 = vmatpush3.bf16.xpose.msk.msra.mxu0 %vm1071_vm1, %v839_v29 }
  0x5f   : > { %783 = vmatmul.mubr.msk.f32.vlgmr.msra.gmra.mrb[0].mxu0 %vm330_vm0, %v301_v30 }
  0x91   : > { %v323_v35 = vpop.permute.xlu0 %322 }
  0x93   : > { %v467_v45 = vpop.permute.xlu1 %466 }
  0x95   : > { %v328_v36 = vpop.permute.xlu0 %327 }
  0x97   : > { %v549_v54 = vpop.permute.xlu1 %548 }
  0x98   : > { %v554_v55 = vrot.slane %v549_v54, %v553_v53 }
 0x132   : > { %v784_v37 = vpop.f32.mrb[0].mxu0 }
 0x133   : > { %v457_v38 = vadd.f32 %v784_v37, %v328_v36  ;;  %v451_v39 = vpop.f32.mrb[1].mxu0 }
 0x134   : > { %v452_v40 = vadd.f32 %v451_v39, %v323_v35 }
 0x135   : > { %v461_v41 = vmax.f32 %v457_v38, 0.0 }
 0x136   : > { %v460_v42 = vmax.f32 %v452_v40, 0.0 }
 0x138   : > { %v846_v43 = vpack.c.bf16 %v461_v41, %v460_v42 }
 0x13a   : > { %847 = vmatpush3.bf16.msra.mxu1 %v846_v43 }
 0x13b   : > { %792 = vmatprep.subr.mxu1 %v960_v32 }
 0x13d   : > { %790 = vmatmul.mubr.msk.f32.vlgmr.msra.gmra.mrb[0].mxu1 %vm469_vm3, %v462_v44 }
 0x13e   : > { %794 = vmatprep.mubr.msk.f32.mxu1 %vm959_vm2, %v960_v32 }
 0x210   : > { %v539_v46 = vpop.f32.mrb[0].mxu1 }
 0x211   : > { %v540_v47 = vadd.f32 %v539_v46, %v467_v45  ;;  %v791_v48 = vpop.f32.mrb[1].mxu1 }
 0x213   : > { %v543_v49 = vmax.f32 %v540_v47, 0.0 }
 0x215   : > { %793 = vmatpush3.msra.mxu1 %v543_v49 }
 0x216   : > { %795 = vmatmul.mubr.msk.f32.vlgmr.msra.gmra.mrb[2].mxu1 %vm555_vm4, %v544_v50 }
 0x2e9   : > { %v625_v56 = vpop.f32.mrb[2].mxu1 }
 0x2ea   : > { %v626_v57 = vadd.f32 %v625_v56, %v554_v55  ;;  %v796_v58 = vpop.f32.mrb[3].mxu1 }
 0x2ec   : > { %629 = vst [vmem:[%s285_s20] sm:$0x1] %v626_v57 }
 0x2ed   : > { %906 = shalt.err (!%p903_p3)
}
 0x2ee   : > { %s907_s14 = scalar_lea.hbm %s1143_s24, 16  ;;  %s911_s17 = scalar_lea.hbm %s1192_s7, 32 }
 0x2ef   : > { %p908_p4 = scmp.ne.s32.totalorder %s1143_s24, %s907_s14  ;;  %p912_p9 = scmp.lt.u32.totalorder %s1143_s24, %s1192_s7 }
 0x2f0   : > { %p913_p10 = scmp.lt.u32.totalorder %s911_s17, %s907_s14  ;;  %p915_p12 = scmp.lt.u32.totalorder %s907_s14, %s1143_s24 }
 0x2f1   : > { %p909_p7 = pnand %p908_p4, %p1040_p5 }
 0x2f2   : > { %p914_p11 = por %p913_p10, %p912_p9 }
 0x2f3   : > { %p910_p8 = pneg %p909_p7 }
 0x2f4   : > { %p916_p13 = por %p915_p12, %p914_p11 }
 0x2f6   : > { %p917_p0 = pnand %p916_p13, %p910_p8 }
 0x2f8   : > { %920 = shalt.err (!%p917_p0)
}
 0x2f9   : > { %848 = dma.vmem_to_hbm [thread:$0]  (%p1040_p5), %s1145_s21, 16, %s1143_s24, %s631_s25  }
 0x2fa PF: > { %p854_p1 = scmp.ge.s32.totalorder %s955_s29, 2  ;;  %s655_s20 = sand.u32 1, %s943_s26  }
 0x2fb   : > { %s656_s22 = scalar_lea.sflag [#allocation4], %s655_s20 }
 0x2fc   : > { %p851_p2 = pnand %p854_p1, %p1044_p6 }
 0x2fe   : > { %938 = dma.done.wait (!%p851_p2), %s656_s22, 16  }
 0x2ff   : > { %940 = vsyncadd (!%p851_p2), %s656_s22, 4294967280  ;;  %p19_p3 = scmp.ge.s32.totalorder %s1028_s8, 4   ;;  %s1197_s26 = smov %s947_s27 }
 0x300   : > { %s1198_s27 = smov %s951_s28  ;;  %s1199_s28 = smov %s1038_s11 }
 0x301   : > { %s1200_s29 = smov %s1028_s8  ;;  %21 = sbr.rel (!%p19_p3) target bundleno = 6 (0x6), region = 83 }
 0x308   :  { %660 = vsyncpa [#allocation4], 1 }
 0x309   :  { %662 = vsyncpa [#allocation4 + $0x1], 1 }

</bundles_post_ra>
